<compile_context>
chip_gen: v7x
topology: tpu7x:2x2x1
jax: 0.10.0
libtpu: 0.0.40
codegen_flags: <defaults>
</compile_context>

<pallas_src>
import functools

import jax
import jax.numpy as jnp
from jax.experimental import pallas as pl
from jax.experimental.pallas import tpu as pltpu

_LANE = 128
_SUBLANE = 8


def _make_freqs(n_freqs: int, log_space: bool):
    """Static Python floats matching the torch.linspace construction in __init__."""
    if log_space:
        freqs = 2.0 ** jnp.linspace(0.0, n_freqs - 1, n_freqs)
    else:
        freqs = jnp.linspace(2.0 ** 0.0, 2.0 ** (n_freqs - 1), n_freqs)
    return [float(f) for f in freqs]


def _pos_enc_kernel(x_ref, o_ref, *, freqs, compute_dtype):
    # x_ref: [tile_r, 128]      flat coordinates (lane dense, 100% vreg util)
    # o_ref: [K, tile_r, 128]   freq-major output slab, K = 1 + 2*n_freqs
    x = x_ref[...]
    o_ref[0] = x                                   # identity embedding
    xc = x.astype(compute_dtype)                   # f32 compute (v5e-safe)
    for i, f in enumerate(freqs):
        s = jnp.sin(xc * f).astype(o_ref.dtype)    # one VPU mul + EUP sin
        o_ref[1 + 2 * i] = s                       # module appends sin twice
        o_ref[2 + 2 * i] = s                       # reuse the computed value


def positional_encoder(x, n_freqs: int, log_space: bool = False,
                       max_rows_per_block: int = 512):
    """x: [N, d_input] -> [N, d_input * (1 + 2*n_freqs)] (PyTorch-identical order)."""
    N, d_input = x.shape
    K = 1 + 2 * n_freqs
    freqs = _make_freqs(n_freqs, log_space)

    # --- flatten to a lane-dense 2-D slab, pad so tiling is exact -----------
    M = N * d_input
    R = -(-M // _LANE)                                   # rows of 128 lanes
    tile_r = min(max_rows_per_block, -(-R // _SUBLANE) * _SUBLANE)
    R_pad = -(-R // tile_r) * tile_r
    M_pad = R_pad * _LANE

    x_flat = x.reshape(-1)
    if M_pad != M:
        x_flat = jnp.pad(x_flat, (0, M_pad - M))         # sin(0)=0; discarded later
    x2d = x_flat.reshape(R_pad, _LANE)

    compute_dtype = jnp.promote_types(x.dtype, jnp.float32)
    kernel = functools.partial(_pos_enc_kernel, freqs=freqs,
                               compute_dtype=compute_dtype)
    itemsize = jnp.dtype(x.dtype).itemsize

    slab = pl.pallas_call(
        kernel,
        out_shape=jax.ShapeDtypeStruct((K, R_pad, _LANE), x.dtype),
        grid_spec=pltpu.PrefetchScalarGridSpec(
            num_scalar_prefetch=0,
            grid=(R_pad // tile_r,),
            in_specs=[pl.BlockSpec((tile_r, _LANE), lambda i: (i, 0))],
            out_specs=pl.BlockSpec((K, tile_r, _LANE), lambda i: (0, i, 0)),
        ),
        compiler_params=pltpu.CompilerParams(
            dimension_semantics=("parallel",),
        ),
        cost_estimate=pl.CostEstimate(
            flops=M * n_freqs,
            transcendentals=M * n_freqs,
            bytes_accessed=(M + K * M) * itemsize,
        ),
    )(x2d)

    # Layout plumbing back to the module's output order:
    #   out[n, k*d_input + j] = slab[k, n*d_input + j]
    y = slab.reshape(K, M_pad)[:, :M].reshape(K, N, d_input)
    return jnp.transpose(y, (1, 0, 2)).reshape(N, K * d_input)


def positional_encoder_ref(x, n_freqs: int, log_space: bool = False):
    """Pure-JAX reference mirroring the PyTorch forward."""
    freqs = _make_freqs(n_freqs, log_space)
    parts = [x]
    for f in freqs:
        parts.append(jnp.sin(x * f))
        parts.append(jnp.sin(x * f))
    return jnp.concatenate(parts, axis=-1)


if __name__ == "__main__":
    key = jax.random.PRNGKey(0)

    # Small, module-consistent shapes: N coordinates of dimension 3.
    N, d_input, n_freqs = 16, 3, 4          # d_output = 3 * (1 + 8) = 27
    x = jax.random.normal(key, (N, d_input), dtype=jnp.float32)

    out = positional_encoder(x, n_freqs=n_freqs, log_space=False)
    out = jax.block_until_ready(out)
    ref = positional_encoder_ref(x, n_freqs=n_freqs, log_space=False)
    assert out.shape == (N, d_input * (1 + 2 * n_freqs))
    assert jnp.allclose(out, ref, atol=1e-5, rtol=1e-5)

    # Second check: uneven N (padding path) + multi-block grid + log_space.
    N2, n_freqs2 = 1000, 6
    x2 = jax.random.normal(jax.random.PRNGKey(1), (N2, d_input), dtype=jnp.float32)
    out2 = positional_encoder(x2, n_freqs=n_freqs2, log_space=True,
                              max_rows_per_block=8)   # force grid > 1
    out2 = jax.block_until_ready(out2)
    ref2 = positional_encoder_ref(x2, n_freqs=n_freqs2, log_space=True)
    assert out2.shape == (N2, d_input * (1 + 2 * n_freqs2))
    assert jnp.allclose(out2, ref2, atol=1e-5, rtol=1e-5)

    print("KERNEL_OK")
</pallas_src>

<mosaic_0001>
module attributes {stable_mosaic.version = 11 : i64} {
  func.func @_pos_enc_kernel(%arg0: i32, %arg1: memref<8x128xf32, #tpu.memory_space<vmem>>, %arg2: memref<9x8x128xf32, #tpu.memory_space<vmem>>) attributes {dimension_semantics = [#tpu.dimension_semantics<parallel>], iteration_bounds = array<i64: 1>, scalar_prefetch = 0 : i64, scratch_operands = 0 : i64, tpu.core_type = #tpu.core_type<tc>, window_params = [{transform_indices = @transform_0, window_bounds = array<i64: 8, 128>}, {transform_indices = @transform_1, window_bounds = array<i64: 9, 8, 128>}]} {
    %c0 = arith.constant 0 : index
    %c0_0 = arith.constant 0 : index
    %0 = vector.load %arg1[%c0, %c0_0] : memref<8x128xf32, #tpu.memory_space<vmem>>, vector<8x128xf32>
    %c0_1 = arith.constant 0 : index
    %c0_2 = arith.constant 0 : index
    %c0_3 = arith.constant 0 : index
    %1 = vector.load %arg2[%c0_1, %c0_2, %c0_3] : memref<9x8x128xf32, #tpu.memory_space<vmem>>, vector<1x8x128xf32>
    %2 = vector.shape_cast %1 : vector<1x8x128xf32> to vector<8x128xf32>
    %3 = vector.shape_cast %0 : vector<8x128xf32> to vector<1x8x128xf32>
    tpu.vector_store %arg2[%c0_1, %c0_2, %c0_3], %3 {strides = array<i32>} : memref<9x8x128xf32, #tpu.memory_space<vmem>>, vector<1x8x128xf32>,
    %cst = arith.constant 1.000000e+00 : f32
    %4 = vector.broadcast %cst : f32 to vector<8x128xf32>
    %5 = arith.mulf %0, %4 : vector<8x128xf32>
    %6 = math.sin %5 : vector<8x128xf32>
    %c1 = arith.constant 1 : index
    %c0_4 = arith.constant 0 : index
    %c0_5 = arith.constant 0 : index
    %7 = vector.load %arg2[%c1, %c0_4, %c0_5] : memref<9x8x128xf32, #tpu.memory_space<vmem>>, vector<1x8x128xf32>
    %8 = vector.shape_cast %7 : vector<1x8x128xf32> to vector<8x128xf32>
    %9 = vector.shape_cast %6 : vector<8x128xf32> to vector<1x8x128xf32>
    tpu.vector_store %arg2[%c1, %c0_4, %c0_5], %9 {strides = array<i32>} : memref<9x8x128xf32, #tpu.memory_space<vmem>>, vector<1x8x128xf32>,
    %c2 = arith.constant 2 : index
    %c0_6 = arith.constant 0 : index
    %c0_7 = arith.constant 0 : index
    %10 = vector.load %arg2[%c2, %c0_6, %c0_7] : memref<9x8x128xf32, #tpu.memory_space<vmem>>, vector<1x8x128xf32>
    %11 = vector.shape_cast %10 : vector<1x8x128xf32> to vector<8x128xf32>
    %12 = vector.shape_cast %6 : vector<8x128xf32> to vector<1x8x128xf32>
    tpu.vector_store %arg2[%c2, %c0_6, %c0_7], %12 {strides = array<i32>} : memref<9x8x128xf32, #tpu.memory_space<vmem>>, vector<1x8x128xf32>,
    %cst_8 = arith.constant 3.33333349 : f32
    %13 = vector.broadcast %cst_8 : f32 to vector<8x128xf32>
    %14 = arith.mulf %0, %13 : vector<8x128xf32>
    %15 = math.sin %14 : vector<8x128xf32>
    %c3 = arith.constant 3 : index
    %c0_9 = arith.constant 0 : index
    %c0_10 = arith.constant 0 : index
    %16 = vector.load %arg2[%c3, %c0_9, %c0_10] : memref<9x8x128xf32, #tpu.memory_space<vmem>>, vector<1x8x128xf32>
    %17 = vector.shape_cast %16 : vector<1x8x128xf32> to vector<8x128xf32>
    %18 = vector.shape_cast %15 : vector<8x128xf32> to vector<1x8x128xf32>
    tpu.vector_store %arg2[%c3, %c0_9, %c0_10], %18 {strides = array<i32>} : memref<9x8x128xf32, #tpu.memory_space<vmem>>, vector<1x8x128xf32>,
    %c4 = arith.constant 4 : index
    %c0_11 = arith.constant 0 : index
    %c0_12 = arith.constant 0 : index
    %19 = vector.load %arg2[%c4, %c0_11, %c0_12] : memref<9x8x128xf32, #tpu.memory_space<vmem>>, vector<1x8x128xf32>
    %20 = vector.shape_cast %19 : vector<1x8x128xf32> to vector<8x128xf32>
    %21 = vector.shape_cast %15 : vector<8x128xf32> to vector<1x8x128xf32>
    tpu.vector_store %arg2[%c4, %c0_11, %c0_12], %21 {strides = array<i32>} : memref<9x8x128xf32, #tpu.memory_space<vmem>>, vector<1x8x128xf32>,
    %cst_13 = arith.constant 5.66666698 : f32
    %22 = vector.broadcast %cst_13 : f32 to vector<8x128xf32>
    %23 = arith.mulf %0, %22 : vector<8x128xf32>
    %24 = math.sin %23 : vector<8x128xf32>
    %c5 = arith.constant 5 : index
    %c0_14 = arith.constant 0 : index
    %c0_15 = arith.constant 0 : index
    %25 = vector.load %arg2[%c5, %c0_14, %c0_15] : memref<9x8x128xf32, #tpu.memory_space<vmem>>, vector<1x8x128xf32>
    %26 = vector.shape_cast %25 : vector<1x8x128xf32> to vector<8x128xf32>
    %27 = vector.shape_cast %24 : vector<8x128xf32> to vector<1x8x128xf32>
    tpu.vector_store %arg2[%c5, %c0_14, %c0_15], %27 {strides = array<i32>} : memref<9x8x128xf32, #tpu.memory_space<vmem>>, vector<1x8x128xf32>,
    %c6 = arith.constant 6 : index
    %c0_16 = arith.constant 0 : index
    %c0_17 = arith.constant 0 : index
    %28 = vector.load %arg2[%c6, %c0_16, %c0_17] : memref<9x8x128xf32, #tpu.memory_space<vmem>>, vector<1x8x128xf32>
    %29 = vector.shape_cast %28 : vector<1x8x128xf32> to vector<8x128xf32>
    %30 = vector.shape_cast %24 : vector<8x128xf32> to vector<1x8x128xf32>
    tpu.vector_store %arg2[%c6, %c0_16, %c0_17], %30 {strides = array<i32>} : memref<9x8x128xf32, #tpu.memory_space<vmem>>, vector<1x8x128xf32>,
    %cst_18 = arith.constant 8.000000e+00 : f32
    %31 = vector.broadcast %cst_18 : f32 to vector<8x128xf32>
    %32 = arith.mulf %0, %31 : vector<8x128xf32>
    %33 = math.sin %32 : vector<8x128xf32>
    %c7 = arith.constant 7 : index
    %c0_19 = arith.constant 0 : index
    %c0_20 = arith.constant 0 : index
    %34 = vector.load %arg2[%c7, %c0_19, %c0_20] : memref<9x8x128xf32, #tpu.memory_space<vmem>>, vector<1x8x128xf32>
    %35 = vector.shape_cast %34 : vector<1x8x128xf32> to vector<8x128xf32>
    %36 = vector.shape_cast %33 : vector<8x128xf32> to vector<1x8x128xf32>
    tpu.vector_store %arg2[%c7, %c0_19, %c0_20], %36 {strides = array<i32>} : memref<9x8x128xf32, #tpu.memory_space<vmem>>, vector<1x8x128xf32>,
    %c8 = arith.constant 8 : index
    %c0_21 = arith.constant 0 : index
    %c0_22 = arith.constant 0 : index
    %37 = vector.load %arg2[%c8, %c0_21, %c0_22] : memref<9x8x128xf32, #tpu.memory_space<vmem>>, vector<1x8x128xf32>
    %38 = vector.shape_cast %37 : vector<1x8x128xf32> to vector<8x128xf32>
    %39 = vector.shape_cast %33 : vector<8x128xf32> to vector<1x8x128xf32>
    tpu.vector_store %arg2[%c8, %c0_21, %c0_22], %39 {strides = array<i32>} : memref<9x8x128xf32, #tpu.memory_space<vmem>>, vector<1x8x128xf32>,
    return
  }
  func.func @transform_0(%arg0: i32) -> (i32, i32) {
    %c0_i32 = arith.constant 0 : i32
    %c0_i32_0 = arith.constant 0 : i32
    return %arg0, %c0_i32 : i32, i32
  }
  func.func @transform_1(%arg0: i32) -> (i32, i32, i32) {
    %c0_i32 = arith.constant 0 : i32
    %c0_i32_0 = arith.constant 0 : i32
    %c0_i32_1 = arith.constant 0 : i32
    return %c0_i32, %arg0, %c0_i32_0 : i32, i32, i32
  }
}

</mosaic_0001>

<bundles_post_ra>
// kernel: tpu_custom_call.1
= control target key start
LH: loop header
LB: loop body
LE: loop exit
PB: predicated region body
PF: predicated region fallthrough
CT: control target
= control target key end

     0   :  { %6 = vsyncpa [#allocation3], 0  ;;  %s907_s0 = inlined_call_operand.hbm [shape: f32[8,128], index: 0, kind: input, shape index: {}]   ;;  %s908_s1 = inlined_call_operand.hbm [shape: f32[9,8,128], index: 1, kind: output, shape index: {}]  }
   0x1   :  { %7 = vsyncpa [#allocation4], 0  ;;  %s581_s6 = smov [#allocation2]   ;;  %s533_s10 = scalar_lea.hbm %s907_s0, 128 }
   0x2   :  { %s14_s7 = sshll.u32 %s581_s6, 4  ;;  %p534_p0 = scmp.ne.s32.totalorder %s907_s0, %s533_s10  ;;  %s15_s7 = int_to_ptr.vmem [resolvable:$true] %s14_s7 }
   0x3   :  { %p537_p1 = scmp.lt.u32.totalorder %s533_s10, %s907_s0 }
   0x5   :  { %p539_p2 = pnand %p537_p1, %p534_p0 }
   0x7   :  { %542 = shalt.err (!%p539_p2)
}
   0x8   :  { %s543_s15 = scalar_lea.vmem %s15_s7, 128  ;;  %p548_p4 = scmp.lt.s32.totalorder %s15_s7, %s15_s7 }
   0x9   :  { %p544_p3 = scmp.ne.s32.totalorder %s15_s7, %s543_s15  ;;  %p549_p5 = scmp.lt.s32.totalorder %s543_s15, %s543_s15 }
   0xb   :  { %p550_p6 = por %p549_p5, %p548_p4 }
   0xd   :  { %p551_p7 = pnand %p550_p6, %p544_p3 }
   0xf   :  { %554 = shalt.err (!%p551_p7)
}
  0x10   :  { %17 = dma.hbm_to_vmem [thread:$0]  %s907_s0, 128, %s15_s7, [#allocation3]  }
  0x11   :  { %577 = dma.done.wait [#allocation3], 128  }
  0x12   :  { %578 = vsyncadd [#allocation3], 4294967168  ;;  %v613_v0 = vld [vmem:[#allocation2] sm:$0xff]  ;;  %v582_v27 = vmov 683565275   ;;  %s588_s0 = smov [#allocation5]  }
  0x13   :  { %22 = vst [vmem:[#allocation5] sm:$0xff] %v613_v0  ;;  %v23_v1 = vand.u32 2147483647, %v613_v0  ;;  %v26_v2 = vand.u32 2139095040, %v613_v0  ;;  %v619_v3 = vmul.f32 3.3333335, %v613_v0 }
  0x14   :  { %v622_v4 = vmul.f32 5.666667, %v613_v0  ;;  %v583_v29 = vmov 2475754826   ;;  %v584_v31 = vmov 2131351028  }
  0x15   :  { %v27_v5 = vshrl.u32 %v26_v2, 23  ;;  %v30_v6 = vand.u32 8388607, %v23_v1  ;;  %v132_v7 = vand.u32 2147483647, %v619_v3  ;;  %v135_v8 = vand.u32 2139095040, %v619_v3 }
  0x16   :  { %v244_v12 = vand.u32 2139095040, %v622_v4  ;;  %v241_v22 = vand.u32 2147483647, %v622_v4  ;;  %v585_v33 = vmov 2102212464   ;;  %vm25_vm13 = vcmp.lt.s32.totalorder %v613_v0, 0 }
  0x17   :  { %v475_v9 = vadd.s32 4294967169, %v27_v5  ;;  %v136_v10 = vshrl.u32 %v135_v8, 23  ;;  %v139_v11 = vand.u32 8388607, %v132_v7  ;;  %v31_v14 = vor.u32 8388608, %v30_v6  ;;  %s463_s18 = sshll.u32 %s588_s0, 4  ;;  %s464_s18 = int_to_ptr.vmem [resolvable:$true] %s463_s18 }
  0x18   :  { %v245_v17 = vshrl.u32 %v244_v12, 23  ;;  %v586_v35 = vmov 920167782   ;;  %v587_v42 = vmov 1326507024   ;;  %s555_s19 = scalar_lea.vmem %s464_s18, 1152  ;;  %p560_p9 = scmp.lt.s32.totalorder %s464_s18, %s464_s18 }
  0x19   :  { %v33_v13 = vadd.s32 1, %v475_v9  ;;  %v479_v15 = vadd.s32 4294967169, %v136_v10  ;;  %v140_v16 = vor.u32 8388608, %v139_v11  ;;  %v632_v23 = vshll.u32 %v31_v14, 8  ;;  %p556_p8 = scmp.ne.s32.totalorder %s464_s18, %s555_s19  ;;  %p561_p10 = scmp.lt.s32.totalorder %s555_s19, %s555_s19 }
  0x1a   :  { %v636_v25 = vadd.s32 4294967169, %v245_v17 }
  0x1b   :  { %vm34_vm0 = vcmp.gt.s32.totalorder %v33_v13, 0  ;;  %v142_v19 = vadd.s32 1, %v479_v15  ;;  %v634_v24 = vshll.u32 %v140_v16, 8  ;;  %p562_p11 = por %p561_p10, %p560_p9 }
  0x1c   :  { %v35_v18 = vsel %vm34_vm0, %v33_v13, 0 }
  0x1d   :  { %v36_v20 = vshrl.u32 %v35_v18, 5  ;;  %v37_v21 = vand.u32 31, %v35_v18  ;;  %vm143_vm1 = vcmp.gt.s32.totalorder %v142_v19, 0  ;;  %p563_p12 = pnand %p562_p11, %p556_p8 }
  0x1e   :  { %v144_v47 = vsel %vm143_vm1, %v142_v19, 0 }
  0x1f   :  { %v38_v26 = vsub.s32 32, %v37_v21  ;;  %v40_v28 = vshll.u32 %v582_v27, %v37_v21  ;;  %v43_v30 = vshll.u32 %v583_v29, %v37_v21  ;;  %v46_v32 = vshll.u32 %v584_v31, %v37_v21 }
  0x20   :  { %v49_v34 = vshll.u32 %v585_v33, %v37_v21  ;;  %v52_v36 = vshll.u32 %v586_v35, %v37_v21  ;;  %vm55_vm2 = vcmp.lt.s32.totalorder %v36_v20, 1  ;;  %vm56_vm3 = vcmp.lt.s32.totalorder %v36_v20, 2 }
  0x21   :  { %v39_v37 = vshrl.u32 %v582_v27, %v38_v26  ;;  %v41_v38 = vshrl.u32 %v583_v29, %v38_v26  ;;  %v44_v39 = vshrl.u32 %v584_v31, %v38_v26  ;;  %v47_v40 = vshrl.u32 %v585_v33, %v38_v26 }
  0x22   :  { %v50_v41 = vshrl.u32 %v586_v35, %v38_v26  ;;  %v53_v43 = vshrl.u32 %v587_v42, %v38_v26  ;;  %vm57_vm4 = vcmp.lt.s32.totalorder %v36_v20, 3  ;;  %vm58_vm5 = vcmp.lt.s32.totalorder %v36_v20, 4 }
  0x23   :  { %v42_v44 = vor.u32 %v41_v38, %v40_v28  ;;  %v45_v45 = vor.u32 %v44_v39, %v43_v30  ;;  %v48_v46 = vor.u32 %v47_v40, %v46_v32  ;;  %v145_v50 = vshrl.u32 %v144_v47, 5 }
  0x24   :  { %v51_v48 = vor.u32 %v50_v41, %v49_v34  ;;  %v54_v49 = vor.u32 %v53_v43, %v52_v36  ;;  %v146_v51 = vand.u32 31, %v144_v47  ;;  %v251_v32 = vadd.s32 1, %v636_v25 }
  0x25   :  { %v59_v52 = vsel %vm55_vm2, %v39_v37, %v42_v44  ;;  %v60_v53 = vsel %vm58_vm5, %v48_v46, 2102212464  ;;  %v63_v54 = vsel %vm55_vm2, %v42_v44, %v45_v45  ;;  %v67_v55 = vsel %vm55_vm2, %v45_v45, %v48_v46 }
  0x26   :  { %v61_v56 = vsel %vm57_vm4, %v45_v45, %v60_v53  ;;  %v64_v57 = vsel %vm58_vm5, %v51_v48, 920167782  ;;  %v68_v58 = vsel %vm58_vm5, %v54_v49, 1326507024  ;;  %v147_v59 = vsub.s32 32, %v146_v51 }
  0x27   :  { %v62_v60 = vsel %vm56_vm3, %v59_v52, %v61_v56  ;;  %v65_v61 = vsel %vm57_vm4, %v48_v46, %v64_v57  ;;  %v69_v62 = vsel %vm57_vm4, %v51_v48, %v68_v58  ;;  %v149_v63 = vshll.u32 %v582_v27, %v146_v51 }
  0x28   :  { %v66_v2 = vsel %vm56_vm3, %v63_v54, %v65_v61  ;;  %v70_v5 = vsel %vm56_vm3, %v67_v55, %v69_v62  ;;  %v78_v6 = vmul.u32 %v632_v23, %v62_v60  ;;  %v148_v8 = vshrl.u32 %v582_v27, %v147_v59 }
  0x29   :  { %v663_v9 = vmul.u32.u64.low %v632_v23, %v70_v5  ;;  %v664_v10 = vmul.u32.u64.high %v632_v23, %v70_v5, %v663_v9  ;;  %v667_v11 = vmul.u32.u64.low %v632_v23, %v66_v2  ;;  %v668_v12 = vmul.u32.u64.high %v632_v23, %v66_v2, %v667_v11 }
  0x2a   :  { %v150_v13 = vshrl.u32 %v583_v29, %v147_v59  ;;  %v152_v14 = vshll.u32 %v583_v29, %v146_v51  ;;  %v153_v15 = vshrl.u32 %v584_v31, %v147_v59  ;;  %v155_v16 = vshll.u32 %v584_v31, %v146_v51 }
  0x2b   :  { %v156_v17 = vshrl.u32 %v585_v33, %v147_v59  ;;  %v158_v18 = vshll.u32 %v585_v33, %v146_v51  ;;  %v159_v19 = vshrl.u32 %v586_v35, %v147_v59  ;;  %v161_v20 = vshll.u32 %v586_v35, %v146_v51 }
  0x2c   :  { %v151_v21 = vor.u32 %v150_v13, %v149_v63  ;;  %v154_v23 = vor.u32 %v153_v15, %v152_v14  ;;  %v162_v26 = vshrl.u32 %v587_v42, %v147_v59  ;;  %vm164_vm6 = vcmp.lt.s32.totalorder %v145_v50, 1 }
  0x2d   :  { %vm80_vm7 = vc.u32 %v664_v10, %v667_v11  ;;  %v81_v28 = vadd.s32 1, %v668_v12  ;;  %v157_v30 = vor.u32 %v156_v17, %v155_v16  ;;  %v160_v34 = vor.u32 %v159_v19, %v158_v18 }
  0x2e   :  { %v163_v36 = vor.u32 %v162_v26, %v161_v20  ;;  %vm165_vm8 = vcmp.lt.s32.totalorder %v145_v50, 2  ;;  %vm166_vm9 = vcmp.lt.s32.totalorder %v145_v50, 3  ;;  %vm167_vm10 = vcmp.lt.s32.totalorder %v145_v50, 4 }
  0x2f   :  { %v82_v37 = vsel %vm80_vm7, %v81_v28, %v668_v12  ;;  %v168_v38 = vsel %vm164_vm6, %v148_v8, %v151_v21  ;;  %v172_v39 = vsel %vm164_vm6, %v151_v21, %v154_v23  ;;  %v169_v41 = vsel %vm167_vm10, %v157_v30, 2102212464 }
  0x30   :  { %v83_v40 = vadd.s32 %v82_v37, %v78_v6  ;;  %v173_v43 = vsel %vm167_vm10, %v160_v34, 920167782  ;;  %v176_v44 = vsel %vm164_vm6, %v154_v23, %v157_v30  ;;  %v170_v45 = vsel %vm166_vm9, %v154_v23, %v169_v41 }
  0x31   :  { %v174_v46 = vsel %vm166_vm9, %v157_v30, %v173_v43  ;;  %v177_v47 = vsel %vm167_vm10, %v163_v36, 1326507024  ;;  %vm252_vm11 = vcmp.gt.s32.totalorder %v251_v32, 0  ;;  %v171_v51 = vsel %vm165_vm8, %v168_v38, %v170_v45 }
  0x32   :  { %v84_v25 = vadd.s32 536870912, %v83_v40  ;;  %v175_v48 = vsel %vm165_vm8, %v172_v39, %v174_v46  ;;  %v178_v49 = vsel %vm166_vm9, %v160_v34, %v177_v47  ;;  %v253_v58 = vsel %vm252_vm11, %v251_v32, 0 }
  0x33   :  { %v179_v52 = vsel %vm165_vm8, %v176_v44, %v178_v49  ;;  %v692_v53 = vmul.u32.u64.low %v634_v24, %v175_v48  ;;  %v693_v54 = vmul.u32.u64.high %v634_v24, %v175_v48, %v692_v53  ;;  %v248_v59 = vand.u32 8388607, %v241_v22 }
  0x34   :  { %v85_v55 = vshrl.u32 %v84_v25, 30  ;;  %v697_v56 = vmul.u32.u64.low %v634_v24, %v179_v52  ;;  %v698_v57 = vmul.u32.u64.high %v634_v24, %v179_v52, %v697_v56  ;;  %v255_v60 = vand.u32 31, %v253_v58 }
  0x35   :  { %v187_v62 = vmul.u32 %v634_v24, %v171_v51  ;;  %v704_v50 = vmul.f32 8.0, %v613_v0  ;;  %v190_v63 = vadd.s32 1, %v693_v54  ;;  %v249_v8 = vor.u32 8388608, %v248_v59 }
  0x36   :  { %v86_v61 = vshll.u32 %v85_v55, 30  ;;  %vm189_vm12 = vc.u32 %v698_v57, %v692_v53  ;;  %v256_v5 = vsub.s32 32, %v255_v60  ;;  %v254_v24 = vshrl.u32 %v253_v58, 5 }
  0x37   :  { %v191_v6 = vsel %vm189_vm12, %v190_v63, %v693_v54  ;;  %v353_v13 = vand.u32 2139095040, %v704_v50  ;;  %v109_v14 = vsub.s32 4, %v85_v55  ;;  %v258_v15 = vshll.u32 %v582_v27, %v255_v60 }
  0x38   :  { %v707_v2 = vsub.s32 %v83_v40, %v86_v61  ;;  %v192_v12 = vadd.s32 %v191_v6, %v187_v62  ;;  %v261_v16 = vshll.u32 %v583_v29, %v255_v60  ;;  %v267_v17 = vshll.u32 %v585_v33, %v255_v60 }
  0x39   :  { %v259_v20 = vshrl.u32 %v583_v29, %v256_v5  ;;  %v262_v21 = vshrl.u32 %v584_v31, %v256_v5  ;;  %v264_v23 = vshll.u32 %v584_v31, %v255_v60  ;;  %v265_v26 = vshrl.u32 %v585_v33, %v256_v5 }
  0x3a   :  { %v89_v9 = vsub.s32 0, %v707_v2  ;;  %v193_v19 = vadd.s32 536870912, %v192_v12  ;;  %v268_v28 = vshrl.u32 %v586_v35, %v256_v5  ;;  %v724_v30 = vshll.u32 %v249_v8, 8 }
  0x3b   :  { %v79_v32 = vadd.s32 %v667_v11, %v664_v10  ;;  %v270_v36 = vshll.u32 %v586_v35, %v255_v60  ;;  %v271_v37 = vshrl.u32 %v587_v42, %v256_v5  ;;  %v110_v38 = vsel %vm25_vm13, %v109_v14, %v85_v55 }
  0x3c   :  { %v476_v18 = vmin.u32 %v89_v9, %v707_v2  ;;  %v732_v39 = vshrl.u32 %v193_v19, 30  ;;  %v269_v40 = vor.u32 %v268_v28, %v267_v17  ;;  %v354_v41 = vshrl.u32 %v353_v13, 23 }
  0x3d   :  { %v260_v44 = vor.u32 %v259_v20, %v258_v15  ;;  %v263_v45 = vor.u32 %v262_v21, %v261_v16  ;;  %vm276_vm14 = vcmp.lt.s32.totalorder %v254_v24, 4  ;;  %v257_v10 = vshrl.u32 %v582_v27, %v256_v5 }
  0x3e   :  { %v91_v34 = vclz %v476_v18  ;;  %v195_v46 = vshll.u32 %v732_v39, 30  ;;  %v266_v11 = vor.u32 %v265_v26, %v264_v23  ;;  %vm273_vm15 = vcmp.lt.s32.totalorder %v254_v24, 1 }
  0x3f   :  { %v272_v47 = vor.u32 %v271_v37, %v270_v36  ;;  %vm275_vm1 = vcmp.lt.s32.totalorder %v254_v24, 3  ;;  %v282_v25 = vsel %vm276_vm14, %v269_v40, 920167782  ;;  %vm274_vm2 = vcmp.lt.s32.totalorder %v254_v24, 2 }
  0x40   :  { %v477_v43 = vadd.s32 4294967294, %v91_v34  ;;  %v196_v49 = vsub.s32 %v192_v12, %v195_v46  ;;  %v278_v51 = vsel %vm276_vm14, %v266_v11, 2102212464  ;;  %v281_v56 = vsel %vm273_vm15, %v260_v44, %v263_v45 }
  0x41   :  { %v277_v59 = vsel %vm273_vm15, %v257_v10, %v260_v44  ;;  %v283_v60 = vsel %vm275_vm1, %v266_v11, %v282_v25  ;;  %v285_v61 = vsel %vm273_vm15, %v263_v45, %v266_v11  ;;  %v279_v5 = vsel %vm275_vm1, %v263_v45, %v278_v51 }
  0x42   :  { %vm478_vm0 = vcmp.lt.s32.totalorder %v477_v43, 0  ;;  %v198_v58 = vsub.s32 0, %v196_v49  ;;  %v286_v6 = vsel %vm276_vm14, %v272_v47, 1326507024  ;;  %vm747_vm3 = vcmp.le.f32.partialorder %v23_v1, 0.7853982 }
  0x43   :  { %v94_v48 = vsel %vm478_vm0, 0, %v477_v43  ;;  %v284_v9 = vsel %vm274_vm2, %v281_v56, %v283_v60  ;;  %v287_v12 = vsel %vm275_vm1, %v269_v40, %v286_v6  ;;  %v487_v16 = vadd.s32 4294967169, %v354_v41 }
  0x44   :  { %v95_v52 = vsub.s32 32, %v94_v48  ;;  %v96_v54 = vshll.u32 %v707_v2, %v94_v48  ;;  %v99_v55 = vsub.s32 4294967266, %v94_v48  ;;  %v480_v8 = vmin.u32 %v198_v58, %v196_v49 }
  0x45   :  { %v288_v15 = vsel %vm274_vm2, %v285_v61, %v287_v12  ;;  %v112_v17 = vsel %vm747_vm3, 0, %v110_v38  ;;  %v280_v19 = vsel %vm274_vm2, %v277_v59, %v279_v5  ;;  %v360_v34 = vadd.s32 1, %v487_v16 }
  0x46   :  { %v97_v62 = vshrl.u32 %v79_v32, %v95_v52  ;;  %v100_v63 = vadd.s32 127, %v99_v55  ;;  %v200_v18 = vclz %v480_v8  ;;  %v350_v37 = vand.u32 2147483647, %v704_v50 }
  0x47   :  { %v758_v21 = vmul.u32.u64.low %v724_v30, %v288_v15  ;;  %v759_v23 = vmul.u32.u64.high %v724_v30, %v288_v15, %v758_v21  ;;  %v762_v28 = vmul.u32.u64.low %v724_v30, %v284_v9  ;;  %v763_v32 = vmul.u32.u64.high %v724_v30, %v284_v9, %v762_v28 }
  0x48   :  { %v98_v13 = vor.u32 %v97_v62, %v96_v54  ;;  %v101_v14 = vshll.u32 %v100_v63, 23  ;;  %v481_v26 = vadd.s32 4294967294, %v200_v18  ;;  %v116_v38 = vadd.s32 3, %v112_v17 }
  0x49   :  { %v188_v24 = vadd.s32 %v692_v53, %v698_v57  ;;  %vm361_vm5 = vcmp.gt.s32.totalorder %v360_v34, 0  ;;  %v296_v43 = vmul.u32 %v724_v30, %v280_v19  ;;  %vm298_vm6 = vc.u32 %v759_v23, %v762_v28 }
  0x4a   :  { %v102_v1 = vor.u32 4788187, %v101_v14  ;;  %v105_v20 = vcvt.s32.f32 %v98_v13  ;;  %vm482_vm4 = vcmp.lt.s32.totalorder %v481_v26, 0  ;;  %v299_v10 = vadd.s32 1, %v763_v32 }
  0x4b   :  { %v203_v41 = vsel %vm482_vm4, 0, %v481_v26  ;;  %vm134_vm7 = vcmp.lt.s32.totalorder %v619_v3, 0  ;;  %v362_v47 = vsel %vm361_vm5, %v360_v34, 0  ;;  %v357_v48 = vand.u32 8388607, %v350_v37 }
  0x4c   :  { %v103_v36 = vand.u32 2147483647, %v102_v1  ;;  %v204_v44 = vsub.s32 32, %v203_v41  ;;  %v205_v45 = vshll.u32 %v196_v49, %v203_v41  ;;  %v208_v46 = vsub.s32 4294967266, %v203_v41 }
  0x4d   :  { %v300_v57 = vsel %vm298_vm6, %v299_v10, %v763_v32  ;;  %v218_v51 = vsub.s32 4, %v732_v39  ;;  %v364_v52 = vand.u32 31, %v362_v47  ;;  %v783_v55 = vand.u32 3, %v116_v38 }
  0x4e   :  { %v106_v40 = vmul.f32 %v105_v20, %v103_v36  ;;  %v206_v25 = vshrl.u32 %v188_v24, %v204_v44  ;;  %v209_v53 = vadd.s32 127, %v208_v46  ;;  %v301_v49 = vadd.s32 %v300_v57, %v296_v43 }
  0x4f   :  { %vm787_vm8 = vcmp.le.f32.partialorder %v132_v7, 0.7853982  ;;  %v365_v61 = vsub.s32 32, %v364_v52  ;;  %v358_v5 = vor.u32 8388608, %v357_v48  ;;  %v219_v6 = vsel %vm134_vm7, %v218_v51, %v732_v39 }
  0x50   :  { %v107_v11 = vxor.u32 2147483648, %v106_v40  ;;  %v207_v56 = vor.u32 %v206_v25, %v205_v45  ;;  %v210_v58 = vshll.u32 %v209_v53, 23  ;;  %v302_v60 = vadd.s32 536870912, %v301_v49 }
  0x51   :  { %v367_v8 = vshll.u32 %v582_v27, %v364_v52  ;;  %v370_v9 = vshll.u32 %v583_v29, %v364_v52  ;;  %vm119_vm9 = vcmp.eq.s32.totalorder %v783_v55, 0  ;;  %v368_v12 = vshrl.u32 %v583_v29, %v365_v61 }
  0x52   :  { %v108_v30 = vsel %vm25_vm13, %v107_v11, %v106_v40  ;;  %v211_v62 = vor.u32 4788187, %v210_v58  ;;  %v214_v63 = vcvt.s32.f32 %v207_v56  ;;  %v794_v2 = vshrl.u32 %v302_v60, 30 }
  0x53   :  { %v111_v54 = vsel %vm747_vm3, %v613_v0, %v108_v30  ;;  %v371_v13 = vshrl.u32 %v584_v31, %v365_v61  ;;  %v376_v14 = vshll.u32 %v585_v33, %v364_v52  ;;  %vm118_vm10 = vcmp.lt.s32.totalorder %v783_v55, 2 }
  0x54   :  { %517 = vcosq.f32 %v111_v54  ;;  %v212_v7 = vand.u32 2147483647, %v211_v62  ;;  %v304_v15 = vshll.u32 %v794_v2, 30  ;;  %v804_v39 = vshrl.u32 %v362_v47, 5 }
  0x55   :  { %519 = vsinq.f32 %v111_v54  ;;  %v373_v16 = vshll.u32 %v584_v31, %v364_v52  ;;  %v374_v17 = vshrl.u32 %v585_v33, %v365_v61  ;;  %vm115_vm11 = vweird.f32 %v613_v0 }
  0x56   :  { %vm122_vm12 = vcmp.eq.s32.totalorder %v783_v55, 2  ;;  %v215_v18 = vmul.f32 %v214_v63, %v212_v7  ;;  %v221_v29 = vsel %vm787_vm8, 0, %v219_v6  ;;  %v377_v19 = vshrl.u32 %v586_v35, %v365_v61 }
  0x57   :  { %v813_v1 = vsub.s32 %v301_v49, %v304_v15  ;;  %v379_v20 = vshll.u32 %v586_v35, %v364_v52  ;;  %v380_v21 = vshrl.u32 %v587_v42, %v365_v61  ;;  %v817_v26 = vshll.u32 %v358_v5, 8 }
  0x58   :  { %v216_v31 = vxor.u32 2147483648, %v215_v18  ;;  %v369_v33 = vor.u32 %v368_v12, %v367_v8  ;;  %v372_v32 = vor.u32 %v371_v13, %v370_v9  ;;  %v378_v34 = vor.u32 %v377_v19, %v376_v14 }
  0x59   :  { %v307_v36 = vsub.s32 0, %v813_v1  ;;  %v375_v38 = vor.u32 %v374_v17, %v373_v16  ;;  %vm382_vm13 = vcmp.lt.s32.totalorder %v804_v39, 1  ;;  %vm385_vm14 = vcmp.lt.s32.totalorder %v804_v39, 4 }
  0x5a   :  { %v217_v24 = vsel %vm134_vm7, %v216_v31, %v215_v18  ;;  %v366_v35 = vshrl.u32 %v582_v27, %v365_v61  ;;  %vm383_vm15 = vcmp.lt.s32.totalorder %v804_v39, 2  ;;  %vm384_vm0 = vcmp.lt.s32.totalorder %v804_v39, 3 }
  0x5b   :  { %v220_v40 = vsel %vm787_vm8, %v619_v3, %v217_v24  ;;  %v484_v41 = vmin.u32 %v307_v36, %v813_v1  ;;  %v381_v43 = vor.u32 %v380_v21, %v379_v20  ;;  %v387_v44 = vsel %vm385_vm14, %v375_v38, 2102212464 }
  0x5c   :  { %521 = vcosq.f32 %v220_v40  ;;  %v390_v27 = vsel %vm382_vm13, %v369_v33, %v372_v32  ;;  %v391_v10 = vsel %vm385_vm14, %v378_v34, 920167782  ;;  %v225_v47 = vadd.s32 3, %v221_v29 }
  0x5d   :  { %523 = vsinq.f32 %v220_v40  ;;  %v309_v25 = vclz %v484_v41  ;;  %v386_v57 = vsel %vm382_vm13, %v366_v35, %v369_v33  ;;  %v388_v48 = vsel %vm384_vm0, %v372_v32, %v387_v44 }
  0x5e   :  { %v518_v42 = vpop.eup %517  ;;  %v392_v30 = vsel %vm384_vm0, %v375_v38, %v391_v10  ;;  %v394_v54 = vsel %vm382_vm13, %v372_v32, %v375_v38  ;;  %v395_v58 = vsel %vm385_vm14, %v381_v43, 1326507024  ;;  %v297_v62 = vadd.s32 %v762_v28, %v759_v23 }
  0x5f   :  { %v520_v45 = vpop.eup %519  ;;  %v123_v46 = vxor.u32 2147483648, %v518_v42  ;;  %v485_v49 = vadd.s32 4294967294, %v309_v25  ;;  %v393_v52 = vsel %vm383_vm15, %v390_v27, %v392_v30  ;;  %v396_v63 = vsel %vm384_vm0, %v378_v34, %v395_v58 }
  0x60   :  { %v120_v11 = vxor.u32 2147483648, %v520_v45  ;;  %v856_v59 = vmul.u32.u64.low %v817_v26, %v393_v52  ;;  %v857_v60 = vmul.u32.u64.high %v817_v26, %v393_v52, %v856_v59  ;;  %v226_v55 = vand.u32 3, %v225_v47 }
  0x61   :  { %v124_v53 = vsel %vm122_vm12, %v123_v46, %v520_v45  ;;  %vm486_vm1 = vcmp.lt.s32.totalorder %v485_v49, 0  ;;  %v397_v6 = vsel %vm383_vm15, %v394_v54, %v396_v63  ;;  %v389_v0 = vsel %vm383_vm15, %v386_v57, %v388_v48 }
  0x62   :  { %v121_v51 = vsel %vm119_vm9, %v518_v42, %v120_v11  ;;  %v312_v5 = vsel %vm486_vm1, 0, %v485_v49  ;;  %v872_v23 = vmul.u32.u64.low %v817_v26, %v397_v6  ;;  %v873_v28 = vmul.u32.u64.high %v817_v26, %v397_v6, %v872_v23 }
  0x63   :  { %v125_v56 = vsel %vm118_vm10, %v121_v51, %v124_v53  ;;  %v313_v8 = vsub.s32 32, %v312_v5  ;;  %v314_v9 = vshll.u32 %v813_v1, %v312_v5  ;;  %v317_v7 = vsub.s32 4294967266, %v312_v5 }
  0x64   :  { %v126_v61 = vsel %vm115_vm11, nan, %v125_v56  ;;  %v408_v14 = vadd.s32 1, %v857_v60  ;;  %vm231_vm2 = vcmp.eq.s32.totalorder %v226_v55, 2  ;;  %v405_v16 = vmul.u32 %v817_v26, %v389_v0 }
  0x65   :  { %128 = vst [vmem:[#allocation5 + $0x8] sm:$0xff] %v126_v61  ;;  %130 = vst [vmem:[#allocation5 + $0x10] sm:$0xff] %v126_v61  ;;  %v315_v12 = vshrl.u32 %v297_v62, %v313_v8  ;;  %v318_v13 = vadd.s32 127, %v317_v7  ;;  %vm228_vm3 = vcmp.eq.s32.totalorder %v226_v55, 0  ;;  %vm224_vm4 = vweird.f32 %v619_v3 }
  0x66   :  { %v522_v15 = vpop.eup %521  ;;  %vm227_vm5 = vcmp.lt.s32.totalorder %v226_v55, 2  ;;  %vm407_vm6 = vc.u32 %v873_v28, %v856_v59  ;;  %v327_v36 = vsub.s32 4, %v794_v2  ;;  %vm243_vm7 = vcmp.lt.s32.totalorder %v622_v4, 0 }
  0x67   :  { %v524_v17 = vpop.eup %523  ;;  %v232_v18 = vxor.u32 2147483648, %v522_v15  ;;  %v316_v29 = vor.u32 %v315_v12, %v314_v9  ;;  %v319_v19 = vshll.u32 %v318_v13, 23  ;;  %v409_v31 = vsel %vm407_vm6, %v408_v14, %v857_v60 }
  0x68   :  { %v229_v39 = vxor.u32 2147483648, %v524_v17  ;;  %v410_v32 = vadd.s32 %v409_v31, %v405_v16  ;;  %vm242_vm8 = vcmp.le.f32.partialorder %v241_v22, 0.7853982  ;;  %v328_v40 = vsel %vm243_vm7, %v327_v36, %v794_v2 }
  0x69   :  { %v233_v1 = vsel %vm231_vm2, %v232_v18, %v524_v17  ;;  %v320_v20 = vor.u32 4788187, %v319_v19  ;;  %v323_v21 = vcvt.s32.f32 %v316_v29  ;;  %v330_v45 = vsel %vm242_vm8, 0, %v328_v40 }
  0x6a   :  { %v230_v33 = vsel %vm228_vm3, %v522_v15, %v229_v39  ;;  %v411_v24 = vadd.s32 536870912, %v410_v32  ;;  %v334_v10 = vadd.s32 3, %v330_v45  ;;  %v406_v22 = vadd.s32 %v856_v59, %v873_v28 }
  0x6b   :  { %v234_v26 = vsel %vm227_vm5, %v230_v33, %v233_v1  ;;  %v321_v34 = vand.u32 2147483647, %v320_v20  ;;  %vm333_vm13 = vweird.f32 %v622_v4  ;;  %vm352_vm14 = vcmp.lt.s32.totalorder %v704_v50, 0 }
  0x6c   :  { %v235_v38 = vsel %vm224_vm4, nan, %v234_v26  ;;  %v412_v35 = vshrl.u32 %v411_v24, 30  ;;  %v335_v25 = vand.u32 3, %v334_v10  ;;  %vm351_vm15 = vcmp.le.f32.partialorder %v350_v37, 0.7853982 }
  0x6d   :  { %237 = vst [vmem:[#allocation5 + $0x18] sm:$0xff] %v235_v38  ;;  %239 = vst [vmem:[#allocation5 + $0x20] sm:$0xff] %v235_v38  ;;  %v324_v3 = vmul.f32 %v323_v21, %v321_v34  ;;  %vm442_vm3 = vweird.f32 %v704_v50 }
  0x6e   :  { %v413_v41 = vshll.u32 %v412_v35, 30  ;;  %vm337_vm10 = vcmp.eq.s32.totalorder %v335_v25, 0  ;;  %vm340_vm11 = vcmp.eq.s32.totalorder %v335_v25, 2  ;;  %vm336_vm12 = vcmp.lt.s32.totalorder %v335_v25, 2 }
  0x6f   :  { %v325_v42 = vxor.u32 2147483648, %v324_v3  ;;  %v436_v9 = vsub.s32 4, %v412_v35 }
  0x70   :  { %v414_v46 = vsub.s32 %v410_v32, %v413_v41 }
  0x71   :  { %v326_v43 = vsel %vm243_vm7, %v325_v42, %v324_v3  ;;  %v437_v0 = vsel %vm352_vm14, %v436_v9, %v412_v35 }
  0x72   :  { %v329_v44 = vsel %vm242_vm8, %v622_v4, %v326_v43  ;;  %v416_v27 = vsub.s32 0, %v414_v46  ;;  %v439_v12 = vsel %vm351_vm15, 0, %v437_v0 }
  0x73   :  { %525 = vcosq.f32 %v329_v44  ;;  %v443_v13 = vadd.s32 3, %v439_v12 }
  0x74   :  { %527 = vsinq.f32 %v329_v44  ;;  %v488_v11 = vmin.u32 %v416_v27, %v414_v46 }
  0x75   :  { %v444_v14 = vand.u32 3, %v443_v13 }
  0x76   :  { %v418_v47 = vclz %v488_v11 }
  0x77   :  { %vm449_vm0 = vcmp.eq.s32.totalorder %v444_v14, 2  ;;  %vm446_vm1 = vcmp.eq.s32.totalorder %v444_v14, 0  ;;  %vm445_vm2 = vcmp.lt.s32.totalorder %v444_v14, 2 }
  0x78   :  { %v489_v53 = vadd.s32 4294967294, %v418_v47 }
  0x7a   :  { %vm490_vm9 = vcmp.lt.s32.totalorder %v489_v53, 0 }
  0x7b   :  { %v421_v2 = vsel %vm490_vm9, 0, %v489_v53 }
  0x7c   :  { %v422_v51 = vsub.s32 32, %v421_v2  ;;  %v423_v49 = vshll.u32 %v414_v46, %v421_v2  ;;  %v426_v52 = vsub.s32 4294967266, %v421_v2 }
  0x7d   :  { %v526_v57 = vpop.eup %525 }
  0x7e   :  { %v528_v48 = vpop.eup %527  ;;  %v341_v30 = vxor.u32 2147483648, %v526_v57  ;;  %v424_v58 = vshrl.u32 %v406_v22, %v422_v51  ;;  %v427_v60 = vadd.s32 127, %v426_v52 }
  0x7f   :  { %v338_v54 = vxor.u32 2147483648, %v528_v48 }
  0x80   :  { %v342_v56 = vsel %vm340_vm11, %v341_v30, %v528_v48  ;;  %v425_v59 = vor.u32 %v424_v58, %v423_v49  ;;  %v428_v63 = vshll.u32 %v427_v60, 23 }
  0x81   :  { %v339_v61 = vsel %vm337_vm10, %v526_v57, %v338_v54 }
  0x82   :  { %v343_v62 = vsel %vm336_vm12, %v339_v61, %v342_v56  ;;  %v429_v5 = vor.u32 4788187, %v428_v63  ;;  %v432_v6 = vcvt.s32.f32 %v425_v59 }
  0x83   :  { %v344_v55 = vsel %vm333_vm13, nan, %v343_v62 }
  0x84   :  { %346 = vst [vmem:[#allocation5 + $0x28] sm:$0xff] %v344_v55  ;;  %348 = vst [vmem:[#allocation5 + $0x30] sm:$0xff] %v344_v55  ;;  %v430_v8 = vand.u32 2147483647, %v429_v5 }
  0x86   :  { %v433_v7 = vmul.f32 %v432_v6, %v430_v8 }
  0x88   :  { %v434_v4 = vxor.u32 2147483648, %v433_v7 }
  0x8a   :  { %v435_v23 = vsel %vm352_vm14, %v434_v4, %v433_v7 }
  0x8b   :  { %v438_v28 = vsel %vm351_vm15, %v704_v50, %v435_v23 }
  0x8c   :  { %529 = vcosq.f32 %v438_v28 }
  0x8d   :  { %531 = vsinq.f32 %v438_v28 }
  0x96   :  { %v530_v15 = vpop.eup %529 }
  0x97   :  { %v532_v16 = vpop.eup %531  ;;  %v450_v17 = vxor.u32 2147483648, %v530_v15 }
  0x98   :  { %v447_v18 = vxor.u32 2147483648, %v532_v16 }
  0x99   :  { %v451_v37 = vsel %vm449_vm0, %v450_v17, %v532_v16 }
  0x9a   :  { %v448_v29 = vsel %vm446_vm1, %v530_v15, %v447_v18 }
  0x9b   :  { %v452_v19 = vsel %vm445_vm2, %v448_v29, %v451_v37 }
  0x9c   :  { %v453_v39 = vsel %vm442_vm3, nan, %v452_v19 }
  0x9d   :  { %455 = vst [vmem:[#allocation5 + $0x38] sm:$0xff] %v453_v39  ;;  %457 = vst [vmem:[#allocation5 + $0x40] sm:$0xff] %v453_v39 }
  0x9e   :  { %566 = shalt.err (!%p563_p12)
}
  0x9f   :  { %s567_s22 = scalar_lea.hbm %s908_s1, 1152 }
  0xa0   :  { %p568_p13 = scmp.ne.s32.totalorder %s908_s1, %s567_s22  ;;  %p571_p0 = scmp.lt.u32.totalorder %s567_s22, %s908_s1 }
  0xa2   :  { %p573_p1 = pnand %p571_p0, %p568_p13 }
  0xa4   :  { %576 = shalt.err (!%p573_p1)
}
  0xa5   :  { %s589_s27 = smov 128   ;;  %s590_s28 = smov 8  }
  0xa6   :  { %469 = dma.vmem_to_hbm [thread:$0]  %s464_s18, 1152, %s908_s1, [#allocation4], %s589_s27, %s589_s27, %s590_s28  }
  0xa7   :  { %579 = dma.done.wait [#allocation4], 1152  }
  0xa8   :  { %580 = vsyncadd [#allocation4], 4294966144 }
  0xa9   :  { %473 = vsyncpa [#allocation3], 1 }
  0xaa   :  { %474 = vsyncpa [#allocation4], 1 }

</bundles_post_ra>
